<compile_context>
chip_gen: v7x
topology: tpu7x:2x2x1
jax: 0.10.0
libtpu: 0.0.40
codegen_flags: <defaults>
</compile_context>

<pallas_src>
import functools

import jax
import jax.numpy as jnp
from jax.experimental import pallas as pl
from jax.experimental.pallas import tpu as pltpu

_MAX_TILE_H = 64  # bound on the static per-row unroll inside the kernel


# ----------------------------------------------------------------------------
# Pallas kernel
# ----------------------------------------------------------------------------
def local_up_kernel(i0_ref, i1_ref, c1_ref, s_ref, wconv_ref, shift_ref,
                    hw_ref, out_ref):
    # i0_ref/i1_ref: (H,) int32 in SMEM   bilinear source rows (scalar prefetch)
    # c1_ref   : (tile_h, W, Cin)  bf16   NHWC tile of c1
    # s_ref    : (H2, W, Cout)     bf16   W-interpolated low-res c2 (per image)
    # wconv_ref: (Cin, Cout)       bf16   1x1 conv weight with BN scale folded
    # shift_ref: (1, Cout)         f32    folded BN shift
    # hw_ref   : (tile_h, 2)       f32    per-output-row bilinear weights [w0, w1]
    # out_ref  : (tile_h, W, Cout)        output tile (pixels, Cout) layout
    h_idx = pl.program_id(1)
    tile_h, W, Cin = c1_ref.shape
    Cout = out_ref.shape[-1]

    # --- 1x1 conv (BN scale folded into wconv) + shift + ReLU ----------------
    # (pixels, Cin) @ (Cin, Cout): bf16 operands, f32 accumulation on the MXU.
    x = c1_ref[...].reshape(tile_h * W, Cin)
    y = jnp.dot(x, wconv_ref[...], preferred_element_type=jnp.float32)
    y = jnp.maximum(y + shift_ref[...], 0.0)                 # (tile_h*W, Cout)
    y = y.reshape(tile_h, W, Cout)

    # --- 2-tap bilinear H-interp fused with the residual add -----------------
    # Stays in the (pixels, Cout) lane layout: per output row, gather the two
    # source rows of s (dynamic leading-dim index) and FMA on the VPU.
    base = h_idx * tile_h
    for t in range(tile_h):                                  # static unroll
        r = base + t
        i0 = i0_ref[r]
        i1 = i1_ref[r]
        w0 = hw_ref[t, 0]
        w1 = hw_ref[t, 1]
        c2u = (w0 * s_ref[i0].astype(jnp.float32)
               + w1 * s_ref[i1].astype(jnp.float32))         # (W, Cout) f32
        out_ref[t] = (y[t] + c2u).astype(out_ref.dtype)


# ----------------------------------------------------------------------------
# Helpers (glue, plain JAX / Python)
# ----------------------------------------------------------------------------
def bilinear_params(out_size, in_size):
    """1-D bilinear (align_corners=True) as two taps: indices i0,i1 and
    weights w0,w1 per output position (PyTorch semantics)."""
    if in_size == 1:
        i0 = jnp.zeros((out_size,), jnp.int32)
        return i0, i0, jnp.ones((out_size,), jnp.float32), jnp.zeros(
            (out_size,), jnp.float32)
    i = jnp.arange(out_size, dtype=jnp.float32)
    if out_size == 1:
        src = jnp.zeros_like(i)
    else:
        src = i * (in_size - 1) / (out_size - 1)
    i0 = jnp.clip(jnp.floor(src).astype(jnp.int32), 0, in_size - 1)
    i1 = jnp.minimum(i0 + 1, in_size - 1)
    w1 = src - i0.astype(jnp.float32)
    w0 = 1.0 - w1
    return i0, i1, w0, w1


def bilinear_interp_matrix(out_size, in_size, dtype=jnp.float32):
    """Dense row-stochastic interpolation matrix (used for the cheap wrapper
    W-interp of the small low-res tensor, and for the reference)."""
    i0, i1, w0, w1 = bilinear_params(out_size, in_size)
    M = jnp.zeros((out_size, in_size), jnp.float32)
    rows = jnp.arange(out_size)
    M = M.at[rows, i0].add(w0)
    M = M.at[rows, i1].add(w1)
    return M.astype(dtype)


def _vmem_limit_and_budget():
    """Generation-aware VMEM limit (leave compiler headroom) and tile budget."""
    phys = None
    try:
        phys = int(pltpu.get_tpu_info().vmem_capacity_bytes)
    except Exception:
        phys = None
    if not phys:
        phys = 64 << 20                      # conservative: v7x per-TensorCore
    vmem_limit = int(min(phys - (8 << 20), 100 << 20))   # headroom / v5e-v6e cap
    vmem_limit = max(vmem_limit, 32 << 20)
    tile_budget = max(vmem_limit - (8 << 20), 16 << 20)  # extra compiler slack
    return vmem_limit, tile_budget


def _choose_tile_h(H, W, Cin, Cout, H2, out_itemsize, budget_bytes):
    """Largest H-tile whose per-step working set fits the budget after
    subtracting the fixed VMEM residents (double-buffered s slab, weights)."""
    fixed = (2 * H2 * W * Cout * 2          # s slab (bf16), double-buffered
             + 2 * Cin * Cout * 2           # wconv (bf16), double-buffered
             + 2 * Cout * 4)                # shift (f32)
    per_row = (2 * W * Cin * 2              # c1 tile (bf16), double-buffered
               + 2 * W * Cout * out_itemsize  # out tile, double-buffered
               + 4 * W * Cout * 4)          # in-kernel f32 intermediates
    avail = max(budget_bytes - fixed, 0)
    cap = max(1, min(avail // max(per_row, 1), _MAX_TILE_H))
    # tile_h must divide H; prefer multiples of 8 (sublane-aligned hw block).
    cands = [t for t in range(8, H + 1, 8) if H % t == 0]
    fitting = [t for t in cands if t <= cap]
    if fitting:
        return max(fitting)
    if cands:
        return min(cands)
    return H                                 # no aligned tiling possible


def local_up_forward_nhwc(c1_nhwc, c2_nhwc, conv_w, gamma, beta, run_mean,
                          run_var, *, tile_h=None, out_dtype=jnp.float32):
    """Transpose-free NHWC entry point.
    c1_nhwc: (N, H, W, Cin), c2_nhwc: (N, H2, W2, Cout), conv_w: (Cout,Cin,1,1).
    Returns (N, H, W, Cout)."""
    eps = 1e-5
    N, H, W, Cin = c1_nhwc.shape
    _, H2, W2, Cout = c2_nhwc.shape

    vmem_limit, tile_budget = _vmem_limit_and_budget()
    out_itemsize = jnp.dtype(out_dtype).itemsize
    if tile_h is None:
        tile_h = _choose_tile_h(H, W, Cin, Cout, H2, out_itemsize, tile_budget)
    assert H % tile_h == 0, (H, tile_h)
    n_h = H // tile_h

    # Fold BN (eval mode) into the conv weight (scale) and a per-channel shift.
    scale = (gamma / jnp.sqrt(run_var + eps)).astype(jnp.float32)      # (Cout,)
    shift = (beta - run_mean * scale).reshape(1, Cout).astype(jnp.float32)
    wconv = (conv_w.reshape(Cout, Cin).T * scale[None, :]).astype(jnp.bfloat16)

    # H-direction 2-tap parameters (scalar-prefetched indices + VMEM weights).
    i0, i1, w0, w1 = bilinear_params(H, H2)
    hw = jnp.stack([w0, w1], axis=1).astype(jnp.float32)               # (H, 2)

    # W-interp of the small low-res c2, done once per image in the wrapper.
    ww = bilinear_interp_matrix(W, W2)                                 # (W, W2)
    s = jnp.einsum('wW,nHWc->nHwc', ww, c2_nhwc.astype(jnp.float32))
    s = s.astype(jnp.bfloat16)                                         # (N,H2,W,Cout)

    c1_bf16 = c1_nhwc.astype(jnp.bfloat16)

    flops = (2 * N * H * W * Cin * Cout      # 1x1 conv
             + 4 * N * H * W * Cout          # 2-tap H-interp
             + N * H * W * Cout)             # residual add
    bytes_accessed = (c1_bf16.size * 2 + s.size * 2
                      + N * H * W * Cout * out_itemsize
                      + wconv.size * 2 + shift.size * 4 + hw.size * 4
                      + (i0.size + i1.size) * 4)

    out = pl.pallas_call(
        local_up_kernel,
        out_shape=jax.ShapeDtypeStruct((N, H, W, Cout), out_dtype),
        grid_spec=pltpu.PrefetchScalarGridSpec(
            num_scalar_prefetch=2,
            grid=(N, n_h),
            in_specs=[
                pl.BlockSpec((None, tile_h, W, Cin),
                             lambda n, h, i0r, i1r: (n, h, 0, 0)),
                pl.BlockSpec((None, H2, W, Cout),
                             lambda n, h, i0r, i1r: (n, 0, 0, 0)),
                pl.BlockSpec((Cin, Cout), lambda n, h, i0r, i1r: (0, 0)),
                pl.BlockSpec((1, Cout), lambda n, h, i0r, i1r: (0, 0)),
                pl.BlockSpec((tile_h, 2), lambda n, h, i0r, i1r: (h, 0)),
            ],
            out_specs=pl.BlockSpec((None, tile_h, W, Cout),
                                   lambda n, h, i0r, i1r: (n, h, 0, 0)),
        ),
        compiler_params=pltpu.CompilerParams(
            dimension_semantics=("parallel", "parallel"),
            vmem_limit_bytes=int(vmem_limit)),
        cost_estimate=pl.CostEstimate(
            flops=int(flops), transcendentals=0,
            bytes_accessed=int(bytes_accessed)),
    )(i0, i1, c1_bf16, s, wconv, shift, hw)
    return out


@functools.partial(jax.jit, static_argnames=('tile_h', 'out_dtype'))
def local_up_forward(c1_nchw, c2_nchw, conv_w, gamma, beta, run_mean, run_var,
                     tile_h=None, out_dtype=jnp.float32):
    """NCHW adapter matching the PyTorch module's calling convention.
    c1_nchw: (N, Cin, H, W), c2_nchw: (N, Cout, H2, W2)."""
    # TODO(synk): these transposes are full-HBM passes; use the NHWC entry
    # point above when the surrounding network is NHWC.
    c1 = jnp.transpose(c1_nchw, (0, 2, 3, 1))
    c2 = jnp.transpose(c2_nchw, (0, 2, 3, 1))
    out = local_up_forward_nhwc(c1, c2, conv_w, gamma, beta, run_mean, run_var,
                                tile_h=tile_h, out_dtype=out_dtype)
    return jnp.transpose(out, (0, 3, 1, 2)).astype(jnp.float32)


# Pure-JAX f32 reference for correctness checking.
def local_up_reference(c1_nchw, c2_nchw, conv_w, gamma, beta, run_mean, run_var):
    eps = 1e-5
    N, Cin, H, W = c1_nchw.shape
    _, Cout, H2, W2 = c2_nchw.shape
    wconv = conv_w.reshape(Cout, Cin)
    c1p = jnp.einsum('oc,nchw->nohw', wconv, c1_nchw)
    scale = (gamma / jnp.sqrt(run_var + eps)).reshape(1, Cout, 1, 1)
    shift = (beta - run_mean * (gamma / jnp.sqrt(run_var + eps))).reshape(
        1, Cout, 1, 1)
    c1p = jnp.maximum(c1p * scale + shift, 0.0)
    wh = bilinear_interp_matrix(H, H2)
    ww = bilinear_interp_matrix(W, W2)
    c2u = jnp.einsum('hH,ncHW->nchW', wh, c2_nchw)
    c2u = jnp.einsum('wW,nchW->nchw', ww, c2u)
    return c1p + c2u


# ----------------------------------------------------------------------------
# Main
# ----------------------------------------------------------------------------
if __name__ == "__main__":
    key = jax.random.PRNGKey(0)
    k1, k2, k3, k4, k5, k6, k7 = jax.random.split(key, 7)

    N, Cin, Cout = 2, 4, 8
    H, W = 16, 16          # c1 spatial
    H2, W2 = 8, 8          # c2 spatial (lower-res feature map, upsampled)

    c1 = jax.random.normal(k1, (N, Cin, H, W), jnp.float32)
    c2 = jax.random.normal(k2, (N, Cout, H2, W2), jnp.float32)

    # Deterministic synthetic parameters.
    conv_w = jax.random.normal(k3, (Cout, Cin, 1, 1), jnp.float32) * 0.1
    gamma = 1.0 + 0.1 * jax.random.normal(k4, (Cout,), jnp.float32)
    beta = 0.1 * jax.random.normal(k5, (Cout,), jnp.float32)
    run_mean = 0.1 * jax.random.normal(k6, (Cout,), jnp.float32)
    run_var = jnp.abs(1.0 + 0.1 * jax.random.normal(k7, (Cout,), jnp.float32))

    # tile_h=8 exercises the multi-H-tile path (grid = (2, 2)) at toy size.
    out = local_up_forward(c1, c2, conv_w, gamma, beta, run_mean, run_var,
                           tile_h=8)
    out = jax.block_until_ready(out)

    ref = local_up_reference(c1, c2, conv_w, gamma, beta, run_mean, run_var)
    assert out.shape == (N, Cout, H, W), out.shape
    # bf16 operands (f32 accumulation) => looser tolerance than pure-f32.
    assert jnp.allclose(out, ref, atol=3e-2, rtol=3e-2), float(
        jnp.max(jnp.abs(out - ref)))

    print("KERNEL_OK")
</pallas_src>

<mosaic_0001>
module attributes {stable_mosaic.version = 11 : i64} {
  func.func private @main(%arg0: i32) attributes {dimension_semantics = [#tpu.dimension_semantics<core_parallel>], iteration_bounds = array<i64: 2>, tpu.core_type = #tpu.core_type<sc_scalar_subcore>, window_params = []} {
    return
  }
}

module attributes {stable_mosaic.version = 11 : i64} {
  func.func private @main(%arg0: i32) attributes {dimension_semantics = [#tpu.dimension_semantics<core_parallel>], iteration_bounds = array<i64: 2>, tpu.core_type = #tpu.core_type<sc_scalar_subcore>, window_params = []} {
    return
  }
}

module attributes {stable_mosaic.version = 11 : i64} {
  func.func @local_up_kernel(%arg0: i32, %arg1: i32, %arg2: memref<16xi32, #tpu.memory_space<smem>>, %arg3: memref<16xi32, #tpu.memory_space<smem>>, %arg4: memref<1x8x16x4xbf16, #tpu.memory_space<vmem>>, %arg5: memref<1x8x16x8xbf16, #tpu.memory_space<vmem>>, %arg6: memref<4x8xbf16, #tpu.memory_space<vmem>>, %arg7: memref<1x8xf32, #tpu.memory_space<vmem>>, %arg8: memref<8x2xf32, #tpu.memory_space<vmem>>, %arg9: memref<1x8x16x8xf32, #tpu.memory_space<vmem>>) attributes {dimension_semantics = [#tpu.dimension_semantics<parallel>, #tpu.dimension_semantics<parallel>], iteration_bounds = array<i64: 2, 2>, scalar_prefetch = 2 : i64, scratch_operands = 0 : i64, tpu.core_type = #tpu.core_type<tc>, window_params = [{transform_indices = @transform_0, window_bounds = array<i64: 1, 8, 16, 4>}, {transform_indices = @transform_1, window_bounds = array<i64: 1, 8, 16, 8>}, {pipeline_mode = #tpu.pipeline_mode<synchronous>, transform_indices = @transform_2, window_bounds = array<i64: 4, 8>}, {pipeline_mode = #tpu.pipeline_mode<synchronous>, transform_indices = @transform_3, window_bounds = array<i64: 1, 8>}, {transform_indices = @transform_4, window_bounds = array<i64: 8, 2>}, {transform_indices = @transform_5, window_bounds = array<i64: 1, 8, 16, 8>}]} {
    %c0 = arith.constant 0 : index
    %c0_0 = arith.constant 0 : index
    %c0_1 = arith.constant 0 : index
    %c0_2 = arith.constant 0 : index
    %0 = vector.load %arg4[%c0, %c0_0, %c0_1, %c0_2] : memref<1x8x16x4xbf16, #tpu.memory_space<vmem>>, vector<1x8x16x4xbf16>
    %1 = vector.shape_cast %0 : vector<1x8x16x4xbf16> to vector<8x16x4xbf16>
    %2 = vector.shape_cast %1 : vector<8x16x4xbf16> to vector<128x4xbf16>
    %c0_3 = arith.constant 0 : index
    %c0_4 = arith.constant 0 : index
    %3 = vector.load %arg6[%c0_3, %c0_4] : memref<4x8xbf16, #tpu.memory_space<vmem>>, vector<4x8xbf16>
    %cst = arith.constant dense<0.000000e+00> : vector<128x8xf32>
    %4 = tpu.matmul %2, %3, %cst {dimension_numbers = #tpu.dot_dimension_numbers<[1], [0], [0], [1], [0, 0, 1, 1], [], []>} : vector<128x4xbf16>, vector<4x8xbf16>, vector<128x8xf32> -> vector<128x8xf32>
    %c0_5 = arith.constant 0 : index
    %c0_6 = arith.constant 0 : index
    %5 = vector.load %arg7[%c0_5, %c0_6] : memref<1x8xf32, #tpu.memory_space<vmem>>, vector<1x8xf32>
    %6 = vector.broadcast %5 : vector<1x8xf32> to vector<128x8xf32>
    %7 = arith.addf %4, %6 : vector<128x8xf32>
    %cst_7 = arith.constant 0.000000e+00 : f32
    %8 = vector.broadcast %cst_7 : f32 to vector<128x8xf32>
    %9 = arith.maximumf %7, %8 : vector<128x8xf32>
    %10 = vector.shape_cast %9 : vector<128x8xf32> to vector<8x16x8xf32>
    %c8_i32 = arith.constant 8 : i32
    %11 = arith.muli %arg1, %c8_i32 : i32
    %c0_i32 = arith.constant 0 : i32
    %12 = arith.addi %11, %c0_i32 : i32
    %13 = arith.index_cast %12 : i32 to index
    %14 = memref.load %arg2[%13] : memref<16xi32, #tpu.memory_space<smem>>
    %15 = arith.index_cast %12 : i32 to index
    %16 = memref.load %arg3[%15] : memref<16xi32, #tpu.memory_space<smem>>
    %c0_8 = arith.constant 0 : index
    %c0_9 = arith.constant 0 : index
    %17 = vector.load %arg8[%c0_8, %c0_9] : memref<8x2xf32, #tpu.memory_space<vmem>>, vector<1x1xf32>
    %18 = vector.extract %17[0, 0] : f32 from vector<1x1xf32>
    %c0_10 = arith.constant 0 : index
    %c1 = arith.constant 1 : index
    %19 = vector.load %arg8[%c0_10, %c1] : memref<8x2xf32, #tpu.memory_space<vmem>>, vector<1x1xf32>
    %20 = vector.extract %19[0, 0] : f32 from vector<1x1xf32>
    %c0_11 = arith.constant 0 : index
    %21 = arith.index_cast %14 : i32 to index
    %c0_12 = arith.constant 0 : index
    %c0_13 = arith.constant 0 : index
    %22 = vector.load %arg5[%c0_11, %21, %c0_12, %c0_13] : memref<1x8x16x8xbf16, #tpu.memory_space<vmem>>, vector<1x1x16x8xbf16>
    %23 = vector.shape_cast %22 : vector<1x1x16x8xbf16> to vector<16x8xbf16>
    %24 = arith.extf %23 : vector<16x8xbf16> to vector<16x8xf32>
    %25 = vector.broadcast %18 : f32 to vector<16x8xf32>
    %26 = arith.mulf %25, %24 : vector<16x8xf32>
    %c0_14 = arith.constant 0 : index
    %27 = arith.index_cast %16 : i32 to index
    %c0_15 = arith.constant 0 : index
    %c0_16 = arith.constant 0 : index
    %28 = vector.load %arg5[%c0_14, %27, %c0_15, %c0_16] : memref<1x8x16x8xbf16, #tpu.memory_space<vmem>>, vector<1x1x16x8xbf16>
    %29 = vector.shape_cast %28 : vector<1x1x16x8xbf16> to vector<16x8xbf16>
    %30 = arith.extf %29 : vector<16x8xbf16> to vector<16x8xf32>
    %31 = vector.broadcast %20 : f32 to vector<16x8xf32>
    %32 = arith.mulf %31, %30 : vector<16x8xf32>
    %33 = arith.addf %26, %32 : vector<16x8xf32>
    %34 = vector.extract_strided_slice %10 {offsets = [0, 0, 0], sizes = [1, 16, 8], strides = [1, 1, 1]} : vector<8x16x8xf32> to vector<1x16x8xf32>
    %35 = vector.shape_cast %34 : vector<1x16x8xf32> to vector<16x8xf32>
    %36 = arith.addf %35, %33 : vector<16x8xf32>
    %c0_17 = arith.constant 0 : index
    %c0_18 = arith.constant 0 : index
    %c0_19 = arith.constant 0 : index
    %c0_20 = arith.constant 0 : index
    %37 = vector.load %arg9[%c0_17, %c0_18, %c0_19, %c0_20] : memref<1x8x16x8xf32, #tpu.memory_space<vmem>>, vector<1x1x16x8xf32>
    %38 = vector.shape_cast %37 : vector<1x1x16x8xf32> to vector<16x8xf32>
    %39 = vector.shape_cast %36 : vector<16x8xf32> to vector<1x1x16x8xf32>
    tpu.vector_store %arg9[%c0_17, %c0_18, %c0_19, %c0_20], %39 {strides = array<i32>} : memref<1x8x16x8xf32, #tpu.memory_space<vmem>>, vector<1x1x16x8xf32>,
    %c1_i32 = arith.constant 1 : i32
    %40 = arith.addi %11, %c1_i32 : i32
    %41 = arith.index_cast %40 : i32 to index
    %42 = memref.load %arg2[%41] : memref<16xi32, #tpu.memory_space<smem>>
    %43 = arith.index_cast %40 : i32 to index
    %44 = memref.load %arg3[%43] : memref<16xi32, #tpu.memory_space<smem>>
    %c1_21 = arith.constant 1 : index
    %c0_22 = arith.constant 0 : index
    %45 = vector.load %arg8[%c1_21, %c0_22] : memref<8x2xf32, #tpu.memory_space<vmem>>, vector<1x1xf32>
    %46 = vector.extract %45[0, 0] : f32 from vector<1x1xf32>
    %c1_23 = arith.constant 1 : index
    %c1_24 = arith.constant 1 : index
    %47 = vector.load %arg8[%c1_23, %c1_24] : memref<8x2xf32, #tpu.memory_space<vmem>>, vector<1x1xf32>
    %48 = vector.extract %47[0, 0] : f32 from vector<1x1xf32>
    %c0_25 = arith.constant 0 : index
    %49 = arith.index_cast %42 : i32 to index
    %c0_26 = arith.constant 0 : index
    %c0_27 = arith.constant 0 : index
    %50 = vector.load %arg5[%c0_25, %49, %c0_26, %c0_27] : memref<1x8x16x8xbf16, #tpu.memory_space<vmem>>, vector<1x1x16x8xbf16>
    %51 = vector.shape_cast %50 : vector<1x1x16x8xbf16> to vector<16x8xbf16>
    %52 = arith.extf %51 : vector<16x8xbf16> to vector<16x8xf32>
    %53 = vector.broadcast %46 : f32 to vector<16x8xf32>
    %54 = arith.mulf %53, %52 : vector<16x8xf32>
    %c0_28 = arith.constant 0 : index
    %55 = arith.index_cast %44 : i32 to index
    %c0_29 = arith.constant 0 : index
    %c0_30 = arith.constant 0 : index
    %56 = vector.load %arg5[%c0_28, %55, %c0_29, %c0_30] : memref<1x8x16x8xbf16, #tpu.memory_space<vmem>>, vector<1x1x16x8xbf16>
    %57 = vector.shape_cast %56 : vector<1x1x16x8xbf16> to vector<16x8xbf16>
    %58 = arith.extf %57 : vector<16x8xbf16> to vector<16x8xf32>
    %59 = vector.broadcast %48 : f32 to vector<16x8xf32>
    %60 = arith.mulf %59, %58 : vector<16x8xf32>
    %61 = arith.addf %54, %60 : vector<16x8xf32>
    %62 = vector.extract_strided_slice %10 {offsets = [1, 0, 0], sizes = [1, 16, 8], strides = [1, 1, 1]} : vector<8x16x8xf32> to vector<1x16x8xf32>
    %63 = vector.shape_cast %62 : vector<1x16x8xf32> to vector<16x8xf32>
    %64 = arith.addf %63, %61 : vector<16x8xf32>
    %c0_31 = arith.constant 0 : index
    %c1_32 = arith.constant 1 : index
    %c0_33 = arith.constant 0 : index
    %c0_34 = arith.constant 0 : index
    %65 = vector.load %arg9[%c0_31, %c1_32, %c0_33, %c0_34] : memref<1x8x16x8xf32, #tpu.memory_space<vmem>>, vector<1x1x16x8xf32>
    %66 = vector.shape_cast %65 : vector<1x1x16x8xf32> to vector<16x8xf32>
    %67 = vector.shape_cast %64 : vector<16x8xf32> to vector<1x1x16x8xf32>
    tpu.vector_store %arg9[%c0_31, %c1_32, %c0_33, %c0_34], %67 {strides = array<i32>} : memref<1x8x16x8xf32, #tpu.memory_space<vmem>>, vector<1x1x16x8xf32>,
    %c2_i32 = arith.constant 2 : i32
    %68 = arith.addi %11, %c2_i32 : i32
    %69 = arith.index_cast %68 : i32 to index
    %70 = memref.load %arg2[%69] : memref<16xi32, #tpu.memory_space<smem>>
    %71 = arith.index_cast %68 : i32 to index
    %72 = memref.load %arg3[%71] : memref<16xi32, #tpu.memory_space<smem>>
    %c2 = arith.constant 2 : index
    %c0_35 = arith.constant 0 : index
    %73 = vector.load %arg8[%c2, %c0_35] : memref<8x2xf32, #tpu.memory_space<vmem>>, vector<1x1xf32>
    %74 = vector.extract %73[0, 0] : f32 from vector<1x1xf32>
    %c2_36 = arith.constant 2 : index
    %c1_37 = arith.constant 1 : index
    %75 = vector.load %arg8[%c2_36, %c1_37] : memref<8x2xf32, #tpu.memory_space<vmem>>, vector<1x1xf32>
    %76 = vector.extract %75[0, 0] : f32 from vector<1x1xf32>
    %c0_38 = arith.constant 0 : index
    %77 = arith.index_cast %70 : i32 to index
    %c0_39 = arith.constant 0 : index
    %c0_40 = arith.constant 0 : index
    %78 = vector.load %arg5[%c0_38, %77, %c0_39, %c0_40] : memref<1x8x16x8xbf16, #tpu.memory_space<vmem>>, vector<1x1x16x8xbf16>
    %79 = vector.shape_cast %78 : vector<1x1x16x8xbf16> to vector<16x8xbf16>
    %80 = arith.extf %79 : vector<16x8xbf16> to vector<16x8xf32>
    %81 = vector.broadcast %74 : f32 to vector<16x8xf32>
    %82 = arith.mulf %81, %80 : vector<16x8xf32>
    %c0_41 = arith.constant 0 : index
    %83 = arith.index_cast %72 : i32 to index
    %c0_42 = arith.constant 0 : index
    %c0_43 = arith.constant 0 : index
    %84 = vector.load %arg5[%c0_41, %83, %c0_42, %c0_43] : memref<1x8x16x8xbf16, #tpu.memory_space<vmem>>, vector<1x1x16x8xbf16>
    %85 = vector.shape_cast %84 : vector<1x1x16x8xbf16> to vector<16x8xbf16>
    %86 = arith.extf %85 : vector<16x8xbf16> to vector<16x8xf32>
    %87 = vector.broadcast %76 : f32 to vector<16x8xf32>
    %88 = arith.mulf %87, %86 : vector<16x8xf32>
    %89 = arith.addf %82, %88 : vector<16x8xf32>
    %90 = vector.extract_strided_slice %10 {offsets = [2, 0, 0], sizes = [1, 16, 8], strides = [1, 1, 1]} : vector<8x16x8xf32> to vector<1x16x8xf32>
    %91 = vector.shape_cast %90 : vector<1x16x8xf32> to vector<16x8xf32>
    %92 = arith.addf %91, %89 : vector<16x8xf32>
    %c0_44 = arith.constant 0 : index
    %c2_45 = arith.constant 2 : index
    %c0_46 = arith.constant 0 : index
    %c0_47 = arith.constant 0 : index
    %93 = vector.load %arg9[%c0_44, %c2_45, %c0_46, %c0_47] : memref<1x8x16x8xf32, #tpu.memory_space<vmem>>, vector<1x1x16x8xf32>
    %94 = vector.shape_cast %93 : vector<1x1x16x8xf32> to vector<16x8xf32>
    %95 = vector.shape_cast %92 : vector<16x8xf32> to vector<1x1x16x8xf32>
    tpu.vector_store %arg9[%c0_44, %c2_45, %c0_46, %c0_47], %95 {strides = array<i32>} : memref<1x8x16x8xf32, #tpu.memory_space<vmem>>, vector<1x1x16x8xf32>,
    %c3_i32 = arith.constant 3 : i32
    %96 = arith.addi %11, %c3_i32 : i32
    %97 = arith.index_cast %96 : i32 to index
    %98 = memref.load %arg2[%97] : memref<16xi32, #tpu.memory_space<smem>>
    %99 = arith.index_cast %96 : i32 to index
    %100 = memref.load %arg3[%99] : memref<16xi32, #tpu.memory_space<smem>>
    %c3 = arith.constant 3 : index
    %c0_48 = arith.constant 0 : index
    %101 = vector.load %arg8[%c3, %c0_48] : memref<8x2xf32, #tpu.memory_space<vmem>>, vector<1x1xf32>
    %102 = vector.extract %101[0, 0] : f32 from vector<1x1xf32>
    %c3_49 = arith.constant 3 : index
    %c1_50 = arith.constant 1 : index
    %103 = vector.load %arg8[%c3_49, %c1_50] : memref<8x2xf32, #tpu.memory_space<vmem>>, vector<1x1xf32>
    %104 = vector.extract %103[0, 0] : f32 from vector<1x1xf32>
    %c0_51 = arith.constant 0 : index
    %105 = arith.index_cast %98 : i32 to index
    %c0_52 = arith.constant 0 : index
    %c0_53 = arith.constant 0 : index
    %106 = vector.load %arg5[%c0_51, %105, %c0_52, %c0_53] : memref<1x8x16x8xbf16, #tpu.memory_space<vmem>>, vector<1x1x16x8xbf16>
    %107 = vector.shape_cast %106 : vector<1x1x16x8xbf16> to vector<16x8xbf16>
    %108 = arith.extf %107 : vector<16x8xbf16> to vector<16x8xf32>
    %109 = vector.broadcast %102 : f32 to vector<16x8xf32>
    %110 = arith.mulf %109, %108 : vector<16x8xf32>
    %c0_54 = arith.constant 0 : index
    %111 = arith.index_cast %100 : i32 to index
    %c0_55 = arith.constant 0 : index
    %c0_56 = arith.constant 0 : index
    %112 = vector.load %arg5[%c0_54, %111, %c0_55, %c0_56] : memref<1x8x16x8xbf16, #tpu.memory_space<vmem>>, vector<1x1x16x8xbf16>
    %113 = vector.shape_cast %112 : vector<1x1x16x8xbf16> to vector<16x8xbf16>
    %114 = arith.extf %113 : vector<16x8xbf16> to vector<16x8xf32>
    %115 = vector.broadcast %104 : f32 to vector<16x8xf32>
    %116 = arith.mulf %115, %114 : vector<16x8xf32>
    %117 = arith.addf %110, %116 : vector<16x8xf32>
    %118 = vector.extract_strided_slice %10 {offsets = [3, 0, 0], sizes = [1, 16, 8], strides = [1, 1, 1]} : vector<8x16x8xf32> to vector<1x16x8xf32>
    %119 = vector.shape_cast %118 : vector<1x16x8xf32> to vector<16x8xf32>
    %120 = arith.addf %119, %117 : vector<16x8xf32>
    %c0_57 = arith.constant 0 : index
    %c3_58 = arith.constant 3 : index
    %c0_59 = arith.constant 0 : index
    %c0_60 = arith.constant 0 : index
    %121 = vector.load %arg9[%c0_57, %c3_58, %c0_59, %c0_60] : memref<1x8x16x8xf32, #tpu.memory_space<vmem>>, vector<1x1x16x8xf32>
    %122 = vector.shape_cast %121 : vector<1x1x16x8xf32> to vector<16x8xf32>
    %123 = vector.shape_cast %120 : vector<16x8xf32> to vector<1x1x16x8xf32>
    tpu.vector_store %arg9[%c0_57, %c3_58, %c0_59, %c0_60], %123 {strides = array<i32>} : memref<1x8x16x8xf32, #tpu.memory_space<vmem>>, vector<1x1x16x8xf32>,
    %c4_i32 = arith.constant 4 : i32
    %124 = arith.addi %11, %c4_i32 : i32
    %125 = arith.index_cast %124 : i32 to index
    %126 = memref.load %arg2[%125] : memref<16xi32, #tpu.memory_space<smem>>
    %127 = arith.index_cast %124 : i32 to index
    %128 = memref.load %arg3[%127] : memref<16xi32, #tpu.memory_space<smem>>
    %c4 = arith.constant 4 : index
    %c0_61 = arith.constant 0 : index
    %129 = vector.load %arg8[%c4, %c0_61] : memref<8x2xf32, #tpu.memory_space<vmem>>, vector<1x1xf32>
    %130 = vector.extract %129[0, 0] : f32 from vector<1x1xf32>
    %c4_62 = arith.constant 4 : index
    %c1_63 = arith.constant 1 : index
    %131 = vector.load %arg8[%c4_62, %c1_63] : memref<8x2xf32, #tpu.memory_space<vmem>>, vector<1x1xf32>
    %132 = vector.extract %131[0, 0] : f32 from vector<1x1xf32>
    %c0_64 = arith.constant 0 : index
    %133 = arith.index_cast %126 : i32 to index
    %c0_65 = arith.constant 0 : index
    %c0_66 = arith.constant 0 : index
    %134 = vector.load %arg5[%c0_64, %133, %c0_65, %c0_66] : memref<1x8x16x8xbf16, #tpu.memory_space<vmem>>, vector<1x1x16x8xbf16>
    %135 = vector.shape_cast %134 : vector<1x1x16x8xbf16> to vector<16x8xbf16>
    %136 = arith.extf %135 : vector<16x8xbf16> to vector<16x8xf32>
    %137 = vector.broadcast %130 : f32 to vector<16x8xf32>
    %138 = arith.mulf %137, %136 : vector<16x8xf32>
    %c0_67 = arith.constant 0 : index
    %139 = arith.index_cast %128 : i32 to index
    %c0_68 = arith.constant 0 : index
    %c0_69 = arith.constant 0 : index
    %140 = vector.load %arg5[%c0_67, %139, %c0_68, %c0_69] : memref<1x8x16x8xbf16, #tpu.memory_space<vmem>>, vector<1x1x16x8xbf16>
    %141 = vector.shape_cast %140 : vector<1x1x16x8xbf16> to vector<16x8xbf16>
    %142 = arith.extf %141 : vector<16x8xbf16> to vector<16x8xf32>
    %143 = vector.broadcast %132 : f32 to vector<16x8xf32>
    %144 = arith.mulf %143, %142 : vector<16x8xf32>
    %145 = arith.addf %138, %144 : vector<16x8xf32>
    %146 = vector.extract_strided_slice %10 {offsets = [4, 0, 0], sizes = [1, 16, 8], strides = [1, 1, 1]} : vector<8x16x8xf32> to vector<1x16x8xf32>
    %147 = vector.shape_cast %146 : vector<1x16x8xf32> to vector<16x8xf32>
    %148 = arith.addf %147, %145 : vector<16x8xf32>
    %c0_70 = arith.constant 0 : index
    %c4_71 = arith.constant 4 : index
    %c0_72 = arith.constant 0 : index
    %c0_73 = arith.constant 0 : index
    %149 = vector.load %arg9[%c0_70, %c4_71, %c0_72, %c0_73] : memref<1x8x16x8xf32, #tpu.memory_space<vmem>>, vector<1x1x16x8xf32>
    %150 = vector.shape_cast %149 : vector<1x1x16x8xf32> to vector<16x8xf32>
    %151 = vector.shape_cast %148 : vector<16x8xf32> to vector<1x1x16x8xf32>
    tpu.vector_store %arg9[%c0_70, %c4_71, %c0_72, %c0_73], %151 {strides = array<i32>} : memref<1x8x16x8xf32, #tpu.memory_space<vmem>>, vector<1x1x16x8xf32>,
    %c5_i32 = arith.constant 5 : i32
    %152 = arith.addi %11, %c5_i32 : i32
    %153 = arith.index_cast %152 : i32 to index
    %154 = memref.load %arg2[%153] : memref<16xi32, #tpu.memory_space<smem>>
    %155 = arith.index_cast %152 : i32 to index
    %156 = memref.load %arg3[%155] : memref<16xi32, #tpu.memory_space<smem>>
    %c5 = arith.constant 5 : index
    %c0_74 = arith.constant 0 : index
    %157 = vector.load %arg8[%c5, %c0_74] : memref<8x2xf32, #tpu.memory_space<vmem>>, vector<1x1xf32>
    %158 = vector.extract %157[0, 0] : f32 from vector<1x1xf32>
    %c5_75 = arith.constant 5 : index
    %c1_76 = arith.constant 1 : index
    %159 = vector.load %arg8[%c5_75, %c1_76] : memref<8x2xf32, #tpu.memory_space<vmem>>, vector<1x1xf32>
    %160 = vector.extract %159[0, 0] : f32 from vector<1x1xf32>
    %c0_77 = arith.constant 0 : index
    %161 = arith.index_cast %154 : i32 to index
    %c0_78 = arith.constant 0 : index
    %c0_79 = arith.constant 0 : index
    %162 = vector.load %arg5[%c0_77, %161, %c0_78, %c0_79] : memref<1x8x16x8xbf16, #tpu.memory_space<vmem>>, vector<1x1x16x8xbf16>
    %163 = vector.shape_cast %162 : vector<1x1x16x8xbf16> to vector<16x8xbf16>
    %164 = arith.extf %163 : vector<16x8xbf16> to vector<16x8xf32>
    %165 = vector.broadcast %158 : f32 to vector<16x8xf32>
    %166 = arith.mulf %165, %164 : vector<16x8xf32>
    %c0_80 = arith.constant 0 : index
    %167 = arith.index_cast %156 : i32 to index
    %c0_81 = arith.constant 0 : index
    %c0_82 = arith.constant 0 : index
    %168 = vector.load %arg5[%c0_80, %167, %c0_81, %c0_82] : memref<1x8x16x8xbf16, #tpu.memory_space<vmem>>, vector<1x1x16x8xbf16>
    %169 = vector.shape_cast %168 : vector<1x1x16x8xbf16> to vector<16x8xbf16>
    %170 = arith.extf %169 : vector<16x8xbf16> to vector<16x8xf32>
    %171 = vector.broadcast %160 : f32 to vector<16x8xf32>
    %172 = arith.mulf %171, %170 : vector<16x8xf32>
    %173 = arith.addf %166, %172 : vector<16x8xf32>
    %174 = vector.extract_strided_slice %10 {offsets = [5, 0, 0], sizes = [1, 16, 8], strides = [1, 1, 1]} : vector<8x16x8xf32> to vector<1x16x8xf32>
    %175 = vector.shape_cast %174 : vector<1x16x8xf32> to vector<16x8xf32>
    %176 = arith.addf %175, %173 : vector<16x8xf32>
    %c0_83 = arith.constant 0 : index
    %c5_84 = arith.constant 5 : index
    %c0_85 = arith.constant 0 : index
    %c0_86 = arith.constant 0 : index
    %177 = vector.load %arg9[%c0_83, %c5_84, %c0_85, %c0_86] : memref<1x8x16x8xf32, #tpu.memory_space<vmem>>, vector<1x1x16x8xf32>
    %178 = vector.shape_cast %177 : vector<1x1x16x8xf32> to vector<16x8xf32>
    %179 = vector.shape_cast %176 : vector<16x8xf32> to vector<1x1x16x8xf32>
    tpu.vector_store %arg9[%c0_83, %c5_84, %c0_85, %c0_86], %179 {strides = array<i32>} : memref<1x8x16x8xf32, #tpu.memory_space<vmem>>, vector<1x1x16x8xf32>,
    %c6_i32 = arith.constant 6 : i32
    %180 = arith.addi %11, %c6_i32 : i32
    %181 = arith.index_cast %180 : i32 to index
    %182 = memref.load %arg2[%181] : memref<16xi32, #tpu.memory_space<smem>>
    %183 = arith.index_cast %180 : i32 to index
    %184 = memref.load %arg3[%183] : memref<16xi32, #tpu.memory_space<smem>>
    %c6 = arith.constant 6 : index
    %c0_87 = arith.constant 0 : index
    %185 = vector.load %arg8[%c6, %c0_87] : memref<8x2xf32, #tpu.memory_space<vmem>>, vector<1x1xf32>
    %186 = vector.extract %185[0, 0] : f32 from vector<1x1xf32>
    %c6_88 = arith.constant 6 : index
    %c1_89 = arith.constant 1 : index
    %187 = vector.load %arg8[%c6_88, %c1_89] : memref<8x2xf32, #tpu.memory_space<vmem>>, vector<1x1xf32>
    %188 = vector.extract %187[0, 0] : f32 from vector<1x1xf32>
    %c0_90 = arith.constant 0 : index
    %189 = arith.index_cast %182 : i32 to index
    %c0_91 = arith.constant 0 : index
    %c0_92 = arith.constant 0 : index
    %190 = vector.load %arg5[%c0_90, %189, %c0_91, %c0_92] : memref<1x8x16x8xbf16, #tpu.memory_space<vmem>>, vector<1x1x16x8xbf16>
    %191 = vector.shape_cast %190 : vector<1x1x16x8xbf16> to vector<16x8xbf16>
    %192 = arith.extf %191 : vector<16x8xbf16> to vector<16x8xf32>
    %193 = vector.broadcast %186 : f32 to vector<16x8xf32>
    %194 = arith.mulf %193, %192 : vector<16x8xf32>
    %c0_93 = arith.constant 0 : index
    %195 = arith.index_cast %184 : i32 to index
    %c0_94 = arith.constant 0 : index
    %c0_95 = arith.constant 0 : index
    %196 = vector.load %arg5[%c0_93, %195, %c0_94, %c0_95] : memref<1x8x16x8xbf16, #tpu.memory_space<vmem>>, vector<1x1x16x8xbf16>
    %197 = vector.shape_cast %196 : vector<1x1x16x8xbf16> to vector<16x8xbf16>
    %198 = arith.extf %197 : vector<16x8xbf16> to vector<16x8xf32>
    %199 = vector.broadcast %188 : f32 to vector<16x8xf32>
    %200 = arith.mulf %199, %198 : vector<16x8xf32>
    %201 = arith.addf %194, %200 : vector<16x8xf32>
    %202 = vector.extract_strided_slice %10 {offsets = [6, 0, 0], sizes = [1, 16, 8], strides = [1, 1, 1]} : vector<8x16x8xf32> to vector<1x16x8xf32>
    %203 = vector.shape_cast %202 : vector<1x16x8xf32> to vector<16x8xf32>
    %204 = arith.addf %203, %201 : vector<16x8xf32>
    %c0_96 = arith.constant 0 : index
    %c6_97 = arith.constant 6 : index
    %c0_98 = arith.constant 0 : index
    %c0_99 = arith.constant 0 : index
    %205 = vector.load %arg9[%c0_96, %c6_97, %c0_98, %c0_99] : memref<1x8x16x8xf32, #tpu.memory_space<vmem>>, vector<1x1x16x8xf32>
    %206 = vector.shape_cast %205 : vector<1x1x16x8xf32> to vector<16x8xf32>
    %207 = vector.shape_cast %204 : vector<16x8xf32> to vector<1x1x16x8xf32>
    tpu.vector_store %arg9[%c0_96, %c6_97, %c0_98, %c0_99], %207 {strides = array<i32>} : memref<1x8x16x8xf32, #tpu.memory_space<vmem>>, vector<1x1x16x8xf32>,
    %c7_i32 = arith.constant 7 : i32
    %208 = arith.addi %11, %c7_i32 : i32
    %209 = arith.index_cast %208 : i32 to index
    %210 = memref.load %arg2[%209] : memref<16xi32, #tpu.memory_space<smem>>
    %211 = arith.index_cast %208 : i32 to index
    %212 = memref.load %arg3[%211] : memref<16xi32, #tpu.memory_space<smem>>
    %c7 = arith.constant 7 : index
    %c0_100 = arith.constant 0 : index
    %213 = vector.load %arg8[%c7, %c0_100] : memref<8x2xf32, #tpu.memory_space<vmem>>, vector<1x1xf32>
    %214 = vector.extract %213[0, 0] : f32 from vector<1x1xf32>
    %c7_101 = arith.constant 7 : index
    %c1_102 = arith.constant 1 : index
    %215 = vector.load %arg8[%c7_101, %c1_102] : memref<8x2xf32, #tpu.memory_space<vmem>>, vector<1x1xf32>
    %216 = vector.extract %215[0, 0] : f32 from vector<1x1xf32>
    %c0_103 = arith.constant 0 : index
    %217 = arith.index_cast %210 : i32 to index
    %c0_104 = arith.constant 0 : index
    %c0_105 = arith.constant 0 : index
    %218 = vector.load %arg5[%c0_103, %217, %c0_104, %c0_105] : memref<1x8x16x8xbf16, #tpu.memory_space<vmem>>, vector<1x1x16x8xbf16>
    %219 = vector.shape_cast %218 : vector<1x1x16x8xbf16> to vector<16x8xbf16>
    %220 = arith.extf %219 : vector<16x8xbf16> to vector<16x8xf32>
    %221 = vector.broadcast %214 : f32 to vector<16x8xf32>
    %222 = arith.mulf %221, %220 : vector<16x8xf32>
    %c0_106 = arith.constant 0 : index
    %223 = arith.index_cast %212 : i32 to index
    %c0_107 = arith.constant 0 : index
    %c0_108 = arith.constant 0 : index
    %224 = vector.load %arg5[%c0_106, %223, %c0_107, %c0_108] : memref<1x8x16x8xbf16, #tpu.memory_space<vmem>>, vector<1x1x16x8xbf16>
    %225 = vector.shape_cast %224 : vector<1x1x16x8xbf16> to vector<16x8xbf16>
    %226 = arith.extf %225 : vector<16x8xbf16> to vector<16x8xf32>
    %227 = vector.broadcast %216 : f32 to vector<16x8xf32>
    %228 = arith.mulf %227, %226 : vector<16x8xf32>
    %229 = arith.addf %222, %228 : vector<16x8xf32>
    %230 = vector.extract_strided_slice %10 {offsets = [7, 0, 0], sizes = [1, 16, 8], strides = [1, 1, 1]} : vector<8x16x8xf32> to vector<1x16x8xf32>
    %231 = vector.shape_cast %230 : vector<1x16x8xf32> to vector<16x8xf32>
    %232 = arith.addf %231, %229 : vector<16x8xf32>
    %c0_109 = arith.constant 0 : index
    %c7_110 = arith.constant 7 : index
    %c0_111 = arith.constant 0 : index
    %c0_112 = arith.constant 0 : index
    %233 = vector.load %arg9[%c0_109, %c7_110, %c0_111, %c0_112] : memref<1x8x16x8xf32, #tpu.memory_space<vmem>>, vector<1x1x16x8xf32>
    %234 = vector.shape_cast %233 : vector<1x1x16x8xf32> to vector<16x8xf32>
    %235 = vector.shape_cast %232 : vector<16x8xf32> to vector<1x1x16x8xf32>
    tpu.vector_store %arg9[%c0_109, %c7_110, %c0_111, %c0_112], %235 {strides = array<i32>} : memref<1x8x16x8xf32, #tpu.memory_space<vmem>>, vector<1x1x16x8xf32>,
    return
  }
  func.func @transform_0(%arg0: i32, %arg1: i32, %arg2: memref<16xi32, #tpu.memory_space<smem>>, %arg3: memref<16xi32, #tpu.memory_space<smem>>) -> (i32, i32, i32, i32) {
    %c0_i32 = arith.constant 0 : i32
    %c0_i32_0 = arith.constant 0 : i32
    %c0_i32_1 = arith.constant 0 : i32
    return %arg0, %arg1, %c0_i32, %c0_i32_0 : i32, i32, i32, i32
  }
  func.func @transform_1(%arg0: i32, %arg1: i32, %arg2: memref<16xi32, #tpu.memory_space<smem>>, %arg3: memref<16xi32, #tpu.memory_space<smem>>) -> (i32, i32, i32, i32) {
    %c0_i32 = arith.constant 0 : i32
    %c0_i32_0 = arith.constant 0 : i32
    %c0_i32_1 = arith.constant 0 : i32
    %c0_i32_2 = arith.constant 0 : i32
    return %arg0, %c0_i32, %c0_i32_0, %c0_i32_1 : i32, i32, i32, i32
  }
  func.func @transform_2(%arg0: i32, %arg1: i32, %arg2: memref<16xi32, #tpu.memory_space<smem>>, %arg3: memref<16xi32, #tpu.memory_space<smem>>) -> (i32, i32) {
    %c0_i32 = arith.constant 0 : i32
    %c0_i32_0 = arith.constant 0 : i32
    %c0_i32_1 = arith.constant 0 : i32
    return %c0_i32, %c0_i32_0 : i32, i32
  }
  func.func @transform_3(%arg0: i32, %arg1: i32, %arg2: memref<16xi32, #tpu.memory_space<smem>>, %arg3: memref<16xi32, #tpu.memory_space<smem>>) -> (i32, i32) {
    %c0_i32 = arith.constant 0 : i32
    %c0_i32_0 = arith.constant 0 : i32
    %c0_i32_1 = arith.constant 0 : i32
    return %c0_i32, %c0_i32_0 : i32, i32
  }
  func.func @transform_4(%arg0: i32, %arg1: i32, %arg2: memref<16xi32, #tpu.memory_space<smem>>, %arg3: memref<16xi32, #tpu.memory_space<smem>>) -> (i32, i32) {
    %c0_i32 = arith.constant 0 : i32
    %c0_i32_0 = arith.constant 0 : i32
    return %arg1, %c0_i32 : i32, i32
  }
  func.func @transform_5(%arg0: i32, %arg1: i32, %arg2: memref<16xi32, #tpu.memory_space<smem>>, %arg3: memref<16xi32, #tpu.memory_space<smem>>) -> (i32, i32, i32, i32) {
    %c0_i32 = arith.constant 0 : i32
    %c0_i32_0 = arith.constant 0 : i32
    %c0_i32_1 = arith.constant 0 : i32
    return %arg0, %arg1, %c0_i32, %c0_i32_0 : i32, i32, i32, i32
  }
}

</mosaic_0001>

<bundles_post_ra>
// kernel: local_up_forward.1
= control target key start
LH: loop header
LB: loop body
LE: loop exit
PB: predicated region body
PF: predicated region fallthrough
CT: control target
= control target key end

     0   :  { %s1720_s0 = inlined_call_operand.vmem [shape: s32[16], index: 0, kind: input, shape index: {}]   ;;  %s1721_s2 = inlined_call_operand.vmem [shape: bf16[2,16,16,4], index: 2, kind: input, shape index: {}]   ;;  %s1722_s3 = inlined_call_operand.vmem [shape: bf16[2,8,16,8], index: 3, kind: input, shape index: {}]   ;;  %s1723_s4 = inlined_call_operand.vmem [shape: bf16[4,8], index: 4, kind: input, shape index: {}]   ;;  %s1724_s5 = inlined_call_operand.vmem [shape: f32[1,8], index: 5, kind: input, shape index: {}]   ;;  %s1725_s6 = inlined_call_operand.vmem [shape: f32[16,2], index: 6, kind: input, shape index: {}]   ;;  %s1726_s7 = inlined_call_operand.vmem [shape: f32[2,16,16,8], index: 7, kind: output, shape index: {}]   ;;  %s1727_s1 = inlined_call_operand.vmem [shape: s32[16], index: 1, kind: input, shape index: {}]  }
   0x1   :  { %1731 = sst [smem:[#allocation11_spill]] %s1721_s2  ;;  %s12_s26 = sshll.u32 %s1720_s0, 4  ;;  %s13_s26 = int_to_ptr.vmem [resolvable:$true] %s12_s26 }
   0x2   :  { %1732 = sst [smem:[#allocation12_spill]] %s1722_s3  ;;  %s16_s29 = sshll.u32 %s1727_s1, 4  ;;  %s17_s29 = int_to_ptr.vmem [resolvable:$true] %s16_s29 }
   0x3   :  { %1733 = sst [smem:[#allocation13_spill]] %s1723_s4  ;;  %s1253_s30 = scalar_lea.vmem %s13_s26, 16 }
   0x4   :  { %1734 = sst [smem:[#allocation14_spill]] %s1725_s6  ;;  %p1254_p0 = scmp.ne.s32.totalorder %s13_s26, %s1253_s30 }
   0x5   :  { %p1258_p1 = scmp.lt.s32.totalorder %s13_s26, %s13_s26  ;;  %p1259_p2 = scmp.lt.s32.totalorder %s1253_s30, %s1253_s30 }
   0x7   :  { %p1260_p3 = por %p1259_p2, %p1258_p1 }
   0x9   :  { %p1261_p4 = pnand %p1260_p3, %p1254_p0 }
   0xb   :  { %1264 = shalt.err (!%p1261_p4)  }
   0xc   :  { %s1319_s8 = smov [#allocation3]   ;;  %s1265_s9 = scalar_lea.vmem %s17_s29, 16 }
   0xd   :  { %15 = dma.vmem_to_smem %s13_s26, 16, %s1319_s8, [#allocation2] }
   0xe   :  { %p1266_p5 = scmp.ne.s32.totalorder %s17_s29, %s1265_s9  ;;  %p1270_p6 = scmp.lt.s32.totalorder %s17_s29, %s17_s29 }
   0xf   :  { %p1271_p7 = scmp.lt.s32.totalorder %s1265_s9, %s1265_s9 }
  0x11   :  { %p1272_p8 = por %p1271_p7, %p1270_p6 }
  0x13   :  { %p1273_p9 = pnand %p1272_p8, %p1266_p5 }
  0x15   :  { %1276 = shalt.err (!%p1273_p9)  }
  0x16   :  { %s1320_s0 = smov [#allocation4]  }
  0x17   :  { %19 = dma.vmem_to_smem %s17_s29, 16, %s1320_s0, [#allocation2] }
  0x18   :  { %1297 = dma.done.wait [#allocation2], 32 }
  0x19   :  { %1298 = vsyncadd [#allocation2], 4294967264 }
  0x1a   :  { %21 = sfence }
  0x1b   :  { %s1368_s1 = smov 0   ;;  %s1370_s10 = smov 0  }
  0x1c   :  { %s1372_s11 = smov 0   ;;  %s1374_s12 = smov 0  }
  0x1d   :  { %s1376_s13 = smov 0  }
  0x1e LB: > { %1735 = sst [smem:[#allocation6_spill]] %s1309_s11  ;;  %s36_s14 = sadd.s32 1, %s1309_s11  ;;  %s1317_s13 = sphi %s1376_s13, %s27_s13   ;;  %s1313_s12 = sphi %s1374_s12, %s1748_s12   ;;  %s1309_s11 = sphi %s1372_s11, %s1747_s11   ;;  %s1305_s10 = sphi %s1370_s10, %s1746_s10   ;;  %s1301_s1 = sphi %s1368_s1, %s1745_s1  }
  0x1f   : > { %1736 = sst [smem:[#allocation7_spill]] %s1313_s12  ;;  %s39_s15 = sadd.s32 1, %s1313_s12 }
  0x20   : > { %1737 = sst [smem:[#allocation8_spill]] %s1317_s13  ;;  %p37_p10 = scmp.ge.s32.totalorder %s36_s14, 2 }
  0x21   : > { %p980_p11 = scmp.ge.s32.totalorder %s1317_s13, 1  ;;  %p240_p12 = scmp.lt.s32.totalorder %s1317_s13, 5 }
  0x22   : > { %s1750_s14 = smov (%p37_p10, %s36_s14), 0  ;;  %s1752_s15 = smov (!%p37_p10, %s39_s15), %s1313_s12 }
  0x23   : > { %1738 = sst [smem:[#allocation9_spill]] %s1750_s14  ;;  %p241_p13 = pnand %p980_p11, %p240_p12 }
  0x24   : > { %p41_p0 = scmp.ge.s32.totalorder %s1752_s15, 2  ;;  %s1740_s4 = sld [smem:[#allocation13_spill]] (!%p241_p13)  ;;  %vm408_vm0 = vcmask (!%p241_p13), 1041408   ;;  %vm383_vm1 = vcmask (!%p241_p13), 31744   ;;  %vm559_vm2 = vcmask (!%p241_p13), 64512  }
  0x25   : > { %244 = sbr.rel (%p241_p13) target bundleno = 284 (0x11c), region = 40  ;;  %s1404_s18 = sshll.u32 (!%p241_p13), %s1301_s1, 3 }
  0x26   : > { %s1754_s15 = smov (%p41_p0, %s1752_s15), 0  ;;  %p288_p1 = scmp.lt.s32.totalorder (!%p241_p13), %s1305_s10, 1 }
  0x27   : > { %1739 = sst [smem:[#allocation10_spill]] %s1754_s15  ;;  %p290_p2 = scmp.lt.s32.totalorder (!%p241_p13), %s1404_s18, 15 }
  0x28   : > { %p303_p3 = scmp.lt.s32.totalorder (!%p241_p13), %s1301_s1, 1  ;;  %s1741_s2 = sld [smem:[#allocation11_spill]] (!%p241_p13) }
  0x29   : > { %s1742_s6 = sld [smem:[#allocation14_spill]] (!%p241_p13)  ;;  %s1321_s8 = smov (!%p241_p13), 127  }
  0x2a   : > { %v335_v0 = vld [vmem:[%s1740_s4] sm:$0x3] (!%p241_p13)  ;;  %s562_s9 = sadd.s32 (!%p241_p13), 1, %s1404_s18  ;;  %s526_s0 = sld [smem:[#allocation3 + %s1404_s18]] (!%p241_p13) }
  0x2b   : > { %1168 = vmatprep.subr.msk.bf16.mxu0 (!%p241_p13), %vm408_vm0, %v335_v0  ;;  %1169 = vmatprep.subr.msk.bf16.mxu1 (!%p241_p13), %vm408_vm0, %v335_v0  ;;  %v410_v1 = vsel (!%p241_p13), %vm408_vm0, %v335_v0, 0  ;;  %s563_s16 = sld [smem:[#allocation3 + %s562_s9]] (!%p241_p13)  ;;  %s784_s14 = sadd.s32 (!%p241_p13), 7, %s1404_s18 }
  0x2c   : > { %1149 = vmatpush3.bf16.msra.mxu0 %v410_v1  ;;  %1167 = vmatpush3.bf16.msra.mxu1 %v410_v1  ;;  %s1756_s10 = smov (!%p288_p1, %s1305_s10), 1  ;;  %s1758_s1 = smov (!%p303_p3, %s1301_s1), 1 }
  0x2d   : > { %s291_s19 = scalar_select %p290_p2, %s1404_s18, 15 }
  0x2e   : > { %s983_s20 = sshll.u32 %s1756_s10, 5  ;;  %s987_s27 = sshll.u32 %s1758_s1, 3 }
  0x2f   : > { %s982_s21 = sshll.u32 %s291_s19, 1  ;;  %s306_s30 = scalar_lea.vmem %s1742_s6, %s987_s27 }
  0x30   : > { %s1412_s22 = sadd.s32 %s983_s20, %s982_s21  ;;  %v602_v9 = vld [vmem:[%s306_s30 + $0x2] sm:$0x1]  ;;  %v528_v10 = vld [vmem:[%s306_s30] sm:$0x1]  ;;  %v639_v12 = vld [vmem:[%s306_s30 + $0x3] sm:$0x1] }
  0x31   : > { %s984_s23 = sshll.u32 %s1412_s22, 2  ;;  %605 = vrot.lane.b32.xlu1 %v602_v9, %s1321_s8  ;;  %531 = vrot.lane.b32.xlu0 %v528_v10, %s1321_s8  ;;  %1170 = vpush %v528_v10  ;;  %v565_v13 = vld [vmem:[%s306_s30 + $0x1] sm:$0x1]  ;;  %v713_v14 = vld [vmem:[%s306_s30 + $0x5] sm:$0x1]  ;;  %s527_s1 = sld [smem:[#allocation4 + %s1404_s18]] }
  0x32   : > { %s296_s26 = scalar_lea.vmem %s1741_s2, %s984_s23  ;;  %v676_v15 = vld [vmem:[%s306_s30 + $0x4] sm:$0x1]  ;;  %v787_v16 = vld [vmem:[%s306_s30 + $0x7] sm:$0x1]  ;;  %v750_v17 = vld [vmem:[%s306_s30 + $0x6] sm:$0x1] }
  0x33   : > { %v1245_v2 = vld [vmem:[%s296_s26] sm:$0xff]   ;;  %v1247_v4 = vld [vmem:[%s296_s26 + $0x8] sm:$0xff]   ;;  %v1249_v6 = vld [vmem:[%s296_s26 + $0x10] sm:$0xff]   ;;  %s564_s17 = sld [smem:[#allocation4 + %s562_s9]]  ;;  %s599_s19 = sadd.s32 2, %s1404_s18 }
  0x34   : > { %v1246_v3 = vld [vmem:[%s296_s26 + $0x20] sm:$0xff]   ;;  %1150 = vmatprep.mubr.msk.bf16.mxu0 %vm383_vm1, %v1245_v2  ;;  %v1248_v5 = vld [vmem:[%s296_s26 + $0x28] sm:$0xff]   ;;  %v1250_v7 = vld [vmem:[%s296_s26 + $0x30] sm:$0xff]   ;;  %s1058_s20 = sshll.u32 %s1756_s10, 6  ;;  %s600_s21 = sld [smem:[#allocation3 + %s599_s19]] }
  0x35   : > { %1158 = vmatprep.mubr.msk.bf16.mxu1 %vm383_vm1, %v1246_v3  ;;  %1151 = vmatmul.mubr.msk.bf16.vlgmr.msra.gmra.mrb[0].mxu0 %vm383_vm1, %v1247_v4  ;;  %v1251_v8 = vld [vmem:[%s296_s26 + $0x18] sm:$0xff]   ;;  %s1743_s3 = sld [smem:[#allocation12_spill]]  ;;  %s1059_s27 = sshll.u32 %s526_s0, 3 }
  0x36   : > { %1159 = vmatmul.mubr.msk.bf16.vlgmr.msra.gmra.mrb[0].mxu1 %vm383_vm1, %v1248_v5  ;;  %1154 = vmatprep.mubr.msk.bf16.mxu0 %vm383_vm1, %v1249_v6  ;;  %v1252_v11 = vld [vmem:[%s296_s26 + $0x38] sm:$0xff]   ;;  %s636_s26 = sadd.s32 3, %s1404_s18  ;;  %s601_s28 = sld [smem:[#allocation4 + %s599_s19]] }
  0x37   : > { %1162 = vmatprep.mubr.msk.bf16.mxu1 %vm383_vm1, %v1250_v7  ;;  %642 = vrot.lane.b32.xlu1 %v639_v12, %s1321_s8  ;;  %s1060_s29 = sshll.u32 %s527_s1, 3  ;;  %s1061_s30 = sshll.u32 %s563_s16, 3 }
  0x38   : > { %568 = vrot.lane.b32.xlu0 %v565_v13, %s1321_s8  ;;  %s1444_s23 = sld [smem:[#allocation4 + %s636_s26]]  ;;  %s710_s19 = sadd.s32 5, %s1404_s18 }
  0x39   : > { %s1062_s10 = sshll.u32 %s564_s17, 3  ;;  %s711_s6 = sld [smem:[#allocation3 + %s710_s19]] }
  0x3a   : > { %s1063_s1 = sshll.u32 %s600_s21, 3 }
  0x3b   : > { %716 = vrot.lane.b32.xlu1 %v713_v14, %s1321_s8  ;;  %s1438_s25 = scalar_lea.vmem %s1743_s3, %s1058_s20  ;;  %s673_s20 = sadd.s32 4, %s1404_s18 }
  0x3c   : > { %679 = vrot.lane.b32.xlu0 %v676_v15, %s1321_s8  ;;  %s1442_s9 = scalar_lea.vmem %s1438_s25, %s1059_s27  ;;  %s1448_s24 = scalar_lea.vmem %s1438_s25, %s1060_s29 }
  0x3d   : > { %1155 = vmatmul.mubr.msk.bf16.gmra.mrb[4].mxu0 %vm383_vm1, %v1251_v8  ;;  %s1451_s2 = scalar_lea.vmem %s1438_s25, %s1061_s30  ;;  %s1454_s0 = scalar_lea.vmem %s1438_s25, %s1062_s10  ;;  %v1076_v26 = vld [vmem:[%s1442_s9] sm:$0xff]  }
  0x3e   : > { %1163 = vmatmul.mubr.msk.bf16.gmra.mrb[4].mxu1 %vm383_vm1, %v1252_v11  ;;  %s674_s16 = sld [smem:[#allocation3 + %s673_s20]]  ;;  %s1064_s3 = sshll.u32 %s601_s28, 3  ;;  %v1077_v27 = vunpack.c.l.bf16 %v1076_v26  ;;  %v1078_v28 = vunpack.c.h.bf16 %v1076_v26  ;;  %v1080_v29 = vld [vmem:[%s1448_s24] sm:$0xff]  }
  0x3f   : > { %790 = vrot.lane.b32.xlu1 %v787_v16, %s1321_s8  ;;  %s1460_s17 = scalar_lea.vmem %s1438_s25, %s1063_s1  ;;  %s1463_s15 = scalar_lea.vmem %s1438_s25, %s1064_s3  ;;  %v1505_v30 = vld [vmem:[%s1451_s2] sm:$0xff]   ;;  %v1081_v35 = vunpack.c.l.bf16 %v1080_v29  ;;  %v1082_v36 = vunpack.c.h.bf16 %v1080_v29 }
  0x40   : > { %753 = vrot.lane.b32.xlu0 %v750_v17, %s1321_s8  ;;  %s637_s8 = sld [smem:[#allocation3 + %s636_s26]]  ;;  %s747_s29 = sadd.s32 6, %s1404_s18  ;;  %v1512_v32 = vld [vmem:[%s1454_s0] sm:$0xff]   ;;  %v1085_v37 = vunpack.c.l.bf16 %v1505_v30  ;;  %v1086_v41 = vunpack.c.h.bf16 %v1505_v30 }
  0x41   : > { %s675_s26 = sld [smem:[#allocation4 + %s673_s20]]  ;;  %s1066_s30 = sshll.u32 %s1444_s23, 3  ;;  %v1519_v33 = vld [vmem:[%s1460_s17] sm:$0xff]   ;;  %v1089_v42 = vunpack.c.l.bf16 %v1512_v32  ;;  %v1090_v45 = vunpack.c.h.bf16 %v1512_v32 }
  0x42   : > { %s1467_s10 = sld [smem:[#allocation4 + %s710_s19]]  ;;  %s1069_s12 = sshll.u32 %s711_s6, 3  ;;  %v1522_v34 = vld [vmem:[%s1463_s15] sm:$0xff]   ;;  %v1093_v46 = vunpack.c.l.bf16 %v1519_v33  ;;  %v1094_v47 = vunpack.c.h.bf16 %v1519_v33 }
  0x43   : > { %s1475_s20 = sld [smem:[#allocation3 + %s747_s29]]  ;;  %s1501_s13 = scalar_lea.vmem %s1438_s25, %s1069_s12  ;;  %v1097_v48 = vunpack.c.l.bf16 %v1522_v34  ;;  %v1098_v51 = vunpack.c.h.bf16 %v1522_v34 }
  0x44   : > { %s1477_s3 = sld [smem:[#allocation4 + %s747_s29]]  ;;  %v1116_v54 = vld [vmem:[%s1501_s13] sm:$0xff]  }
  0x45   : > { %s1481_s23 = sld [smem:[#allocation3 + %s784_s14]]  ;;  %v1117_v4 = vunpack.c.l.bf16 %v1116_v54  ;;  %v1118_v5 = vunpack.c.h.bf16 %v1116_v54 }
  0x46   : > { %s1065_s4 = sshll.u32 %s637_s8, 3  ;;  %s1067_s8 = sshll.u32 %s674_s16, 3 }
  0x47   : > { %s1470_s21 = scalar_lea.vmem %s1438_s25, %s1065_s4  ;;  %s1068_s19 = sshll.u32 %s675_s26, 3 }
  0x48   : > { %s1483_s4 = sld [smem:[#allocation4 + %s784_s14]]  ;;  %s1489_s16 = scalar_lea.vmem %s1438_s25, %s1066_s30  ;;  %v1529_v38 = vld [vmem:[%s1470_s21] sm:$0xff]  }
  0x49   : > { %s1492_s29 = scalar_lea.vmem %s1438_s25, %s1067_s8  ;;  %s1070_s26 = sshll.u32 %s1467_s10, 3  ;;  %v1538_v43 = vld [vmem:[%s1489_s16] sm:$0xff]   ;;  %v1101_v52 = vunpack.c.l.bf16 %v1529_v38  ;;  %v1102_v53 = vunpack.c.h.bf16 %v1529_v38 }
  0x4a   : > { %s1498_s14 = scalar_lea.vmem %s1438_s25, %s1068_s19  ;;  %s1071_s9 = sshll.u32 %s1475_s20, 3  ;;  %v1541_v44 = vld [vmem:[%s1492_s29] sm:$0xff]   ;;  %v1105_v56 = vunpack.c.l.bf16 %v1538_v43  ;;  %v1106_v57 = vunpack.c.h.bf16 %v1538_v43 }
  0x4b   : > { %s1515_s30 = scalar_lea.vmem %s1438_s25, %s1070_s26  ;;  %s1072_s10 = sshll.u32 %s1477_s3, 3  ;;  %v1549_v49 = vld [vmem:[%s1498_s14] sm:$0xff]   ;;  %v1109_v58 = vunpack.c.l.bf16 %v1541_v44  ;;  %v1110_v59 = vunpack.c.h.bf16 %v1541_v44 }
  0x4c   : > { %s1073_s2 = sshll.u32 %s1481_s23, 3  ;;  %s759_s24 = scalar_lea.vmem %s1438_s25, %s1071_s9  ;;  %v1560_v55 = vld [vmem:[%s1515_s30] sm:$0xff]   ;;  %v1113_v0 = vunpack.c.l.bf16 %v1549_v49  ;;  %v1114_v1 = vunpack.c.h.bf16 %v1549_v49 }
  0x4d   : > { %s796_s17 = scalar_lea.vmem %s1438_s25, %s1073_s2  ;;  %v1567_v60 = vld [vmem:[%s759_s24] sm:$0xff]   ;;  %v1121_v6 = vunpack.c.l.bf16 %v1560_v55 }
  0x4e   : > { %s1074_s0 = sshll.u32 %s1483_s4, 3  ;;  %v1577_v2 = vld [vmem:[%s796_s17] sm:$0xff]   ;;  %v1125_v10 = vunpack.c.l.bf16 %v1567_v60  ;;  %s991_s4 = sshll.u32 %s1412_s22, 3 }
  0x4f   : > { %s806_s20 = scalar_lea.vmem %s1438_s25, %s1074_s0  ;;  %s1653_s16 = scalar_lea.vmem %s1726_s7, %s991_s4 }
  0x50   : > { %v1580_v7 = vld [vmem:[%s806_s20] sm:$0xff]  }
  0x62   : > { %s1457_s27 = spop %1170 }
  0x63   : > { %v542_v31 = vstv %s1457_s27  ;;  %s769_s27 = scalar_lea.vmem %s1438_s25, %s1072_s10 }
  0x64   : > { %v543_v39 = vmul.f32 %v1077_v27, %v542_v31  ;;  %v544_v40 = vmul.f32 %v1078_v28, %v542_v31  ;;  %v1569_v61 = vld [vmem:[%s769_s27] sm:$0xff]  }
  0x65   : > { %v1129_v11 = vunpack.c.l.bf16 %v1569_v61 }
  0xa3   : > { %v606_v18 = vpop.permute.xlu1 %605  ;;  %v532_v19 = vpop.permute.xlu0 %531 }
  0xa4   : > { %1172 = vpush %v532_v19  ;;  %v1137_v19 = vunpack.c.l.bf16 %v1580_v7 }
  0xa5   : > { %1174 = vpush %v565_v13 }
  0xa9   : > { %v643_v20 = vpop.permute.xlu1 %642 }
  0xaa   : > { %v569_v21 = vpop.permute.xlu0 %568 }
  0xab   : > { %1176 = vpush %v569_v21 }
  0xac   : > { %1178 = vpush %v602_v9  ;;  %v1122_v9 = vunpack.c.h.bf16 %v1560_v55 }
  0xad   : > { %1180 = vpush %v606_v18  ;;  %v717_v23 = vpop.permute.xlu1 %716  ;;  %v1130_v18 = vunpack.c.h.bf16 %v1569_v61 }
  0xae   : > { %v680_v22 = vpop.permute.xlu0 %679  ;;  %1182 = vpush %v639_v12 }
  0xaf   : > { %1184 = vpush %v643_v20 }
  0xb0   : > { %1186 = vpush %v676_v15  ;;  %v1134_v15 = vunpack.c.h.bf16 %v1577_v2 }
  0xb1   : > { %1188 = vpush %v680_v22  ;;  %v791_v25 = vpop.permute.xlu1 %790 }
  0xb2   : > { %1190 = vpush %v713_v14  ;;  %v754_v24 = vpop.permute.xlu0 %753  ;;  %v1133_v14 = vunpack.c.l.bf16 %v1577_v2 }
  0xb3   : > { %1192 = vpush %v717_v23  ;;  %v1138_v23 = vunpack.c.h.bf16 %v1580_v7 }
  0xb4   : > { %1194 = vpush %v750_v17  ;;  %v1126_v17 = vunpack.c.h.bf16 %v1567_v60 }
  0xb5   : > { %1196 = vpush %v754_v24 }
  0xb6   : > { %1198 = vpush %v787_v16 }
  0xb7   : > { %1200 = vpush %v791_v25 }
  0xd5   : > { %s1473_s28 = spop %1172 }
  0xd6   : > { %s1479_s1 = spop %1174  ;;  %v552_v50 = vstv %s1473_s28 }
  0xd7   : > { %v579_v62 = vstv %s1479_s1  ;;  %v553_v3 = vmul.f32 %v1081_v35, %v552_v50  ;;  %v554_v8 = vmul.f32 %v1082_v36, %v552_v50 }
  0xd8   : > { %v580_v12 = vmul.f32 %v1085_v37, %v579_v62  ;;  %v581_v21 = vmul.f32 %v1086_v41, %v579_v62 }
  0xd9   : > { %v1595_v20 = vadd.f32 %v553_v3, %v543_v39  ;;  %v1601_v24 = vadd.f32 %v554_v8, %v544_v40 }
  0xdc   : > { %s1485_s18 = spop %1176 }
  0xdd   : > { %s1494_s11 = spop %1178  ;;  %v589_v63 = vstv %s1485_s18 }
  0xde   : > { %s1507_s6 = spop %1180  ;;  %v590_v13 = vmul.f32 %v1089_v42, %v589_v63  ;;  %v616_v16 = vstv %s1494_s11  ;;  %v591_v25 = vmul.f32 %v1090_v45, %v589_v63 }
  0xdf   : > { %s1524_s12 = spop %1182  ;;  %v626_v22 = vstv %s1507_s6  ;;  %v617_v29 = vmul.f32 %v1093_v46, %v616_v16  ;;  %v1607_v30 = vmul.f32 %v1094_v47, %v616_v16 }
  0xe0   : > { %s1535_s15 = spop %1184  ;;  %v1605_v28 = vadd.f32 %v590_v13, %v580_v12  ;;  %v627_v32 = vmul.f32 %v1097_v48, %v626_v22  ;;  %v653_v33 = vstv %s1524_s12  ;;  %v593_v41 = vadd.f32 %v591_v25, %v581_v21 }
  0xe1   : > { %s1556_s21 = spop %1186  ;;  %v663_v34 = vstv %s1535_s15  ;;  %v628_v42 = vmul.f32 %v1098_v51, %v626_v22  ;;  %v654_v54 = vmul.f32 %v1101_v52, %v653_v33  ;;  %v655_v51 = vmul.f32 %v1102_v53, %v653_v33 }
  0xe2   : > { %s1573_s28 = spop %1188  ;;  %v690_v26 = vstv %s1556_s21  ;;  %v1621_v50 = vadd.f32 %v627_v32, %v617_v29  ;;  %v664_v55 = vmul.f32 %v1105_v56, %v663_v34 }
  0xe3   : > { %s1582_s13 = spop %1190  ;;  %v700_v27 = vstv %s1573_s28  ;;  %v691_v36 = vmul.f32 %v1109_v58, %v690_v26  ;;  %v692_v37 = vmul.f32 %v1110_v59, %v690_v26  ;;  %v1632_v58 = vld [vmem:[%s1724_s5] ss:$0 sm:$0xff]  ;;  %v665_v59 = vmul.f32 %v1106_v57, %v663_v34 }
  0xe4   : > { %s1590_s25 = spop %1192  ;;  %v727_v31 = vstv %s1582_s13  ;;  %v701_v39 = vmul.f32 %v1113_v0, %v700_v27  ;;  %v702_v40 = vmul.f32 %v1114_v1, %v700_v27 }
  0xe5   : > { %s1598_s8 = spop %1194  ;;  %v737_v35 = vstv %s1590_s25  ;;  %v728_v44 = vmul.f32 %v1117_v4, %v727_v31  ;;  %v729_v45 = vmul.f32 %v1118_v5, %v727_v31 }
  0xe6   : > { %s1610_s11 = spop %1196  ;;  %v738_v46 = vmul.f32 %v1121_v6, %v737_v35  ;;  %v739_v47 = vmul.f32 %v1122_v9, %v737_v35  ;;  %v764_v48 = vstv %s1598_s8  ;;  %v703_v60 = vadd.f32 %v701_v39, %v691_v36 }
  0xe7   : > { %s1615_s3 = spop %1198  ;;  %v774_v49 = vstv %s1610_s11  ;;  %v704_v61 = vadd.f32 %v702_v40, %v692_v37  ;;  %v765_v0 = vmul.f32 %v1125_v10, %v764_v48  ;;  %v766_v52 = vmul.f32 %v1126_v17, %v764_v48 }
  0xe8   : > { %s1619_s1 = spop %1200  ;;  %v801_v62 = vstv %s1615_s3  ;;  %v775_v1 = vmul.f32 %v1129_v11, %v774_v49  ;;  %v740_v53 = vadd.f32 %v738_v46, %v728_v44  ;;  %v741_v3 = vadd.f32 %v739_v47, %v729_v45 }
  0xe9   : > { %v811_v38 = vstv %s1619_s1  ;;  %v776_v6 = vmul.f32 %v1130_v18, %v774_v49  ;;  %v802_v10 = vmul.f32 %v1133_v14, %v801_v62  ;;  %v803_v11 = vmul.f32 %v1134_v15, %v801_v62 }
  0xea   : > { %v812_v18 = vmul.f32 %v1137_v19, %v811_v38  ;;  %v630_v39 = vadd.f32 %v628_v42, %v1607_v30  ;;  %v666_v40 = vadd.f32 %v664_v55, %v654_v54  ;;  %v667_v46 = vadd.f32 %v665_v59, %v655_v51 }
  0xeb   : > { %v778_v47 = vadd.f32 %v776_v6, %v766_v52 }
  0xec   : > { %v814_v48 = vadd.f32 %v812_v18, %v802_v10 }
 0x108   : > { %v1152_v63 = vpop.f32.mrb[0].mxu0 }
 0x109   : > { %v455_v56 = vadd.f32 %v1152_v63, %v1632_v58  ;;  %v1160_v4 = vpop.f32.mrb[0].mxu1  ;;  %v446_v5 = vpop.f32.mrb[1].mxu0 }
 0x10a   : > { %v487_v8 = vadd.f32 %v1160_v4, %v1632_v58  ;;  %v447_v43 = vadd.f32 %v1632_v58, %v446_v5  ;;  %v478_v57 = vpop.f32.mrb[1].mxu1  ;;  %v1153_v9 = vpop.f32.mrb[2].mxu0 }
 0x10b   : > { %v511_v12 = vmax.f32 %v455_v56, 0.0  ;;  %v479_v13 = vadd.f32 %v1632_v58, %v478_v57  ;;  %v458_v16 = vadd.f32 %v1153_v9, %v1632_v58  ;;  %v1161_v17 = vpop.f32.mrb[2].mxu1  ;;  %v449_v21 = vpop.f32.mrb[3].mxu0 }
 0x10c   : > { %v519_v14 = vmax.f32 %v487_v8, 0.0  ;;  %v509_v22 = vmax.f32 %v447_v43, 0.0  ;;  %v490_v2 = vadd.f32 %v1161_v17, %v1632_v58  ;;  %v450_v15 = vadd.f32 %v1632_v58, %v449_v21  ;;  %v481_v25 = vpop.f32.mrb[3].mxu1 }
 0x10d   : > { %v594_v26 = vadd.f32 %v1605_v28, %v511_v12  ;;  %v517_v27 = vmax.f32 %v479_v13, 0.0  ;;  %v512_v29 = vmax.f32 %v458_v16, 0.0  ;;  %v482_v19 = vadd.f32 %v1632_v58, %v481_v25 }
 0x10e   : > { %v742_v31 = vadd.f32 %v740_v53, %v519_v14  ;;  %v557_v32 = vadd.f32 %v1595_v20, %v509_v22  ;;  %v520_v33 = vmax.f32 %v490_v2, 0.0  ;;  %v510_v34 = vmax.f32 %v450_v15, 0.0 }
 0x10f   : > { %1018 = vst.msk [vmem:[%s1653_s16 + $0x10] sm:$0xff] %vm559_vm2, %v594_v26  ;;  %v705_v35 = vadd.f32 %v703_v60, %v517_v27  ;;  %v595_v36 = vadd.f32 %v593_v41, %v512_v29  ;;  %v518_v37 = vmax.f32 %v482_v19, 0.0  ;;  %v813_v28 = vmul.f32 %v1138_v23, %v811_v38 }
 0x110   : > { %1042 = vst.msk [vmem:[%s1653_s16 + $0x50] sm:$0xff] %vm559_vm2, %v742_v31  ;;  %560 = vst.msk [vmem:[%s1653_s16] sm:$0xff] %vm559_vm2, %v557_v32  ;;  %v743_v20 = vadd.f32 %v741_v3, %v520_v33  ;;  %v558_v44 = vadd.f32 %v1601_v24, %v510_v34  ;;  %v1156_v45 = vpop.f32.mrb[4].mxu0  ;;  %v777_v23 = vadd.f32 %v775_v1, %v765_v0 }
 0x111   : > { %1036 = vst.msk [vmem:[%s1653_s16 + $0x40] sm:$0xff] %vm559_vm2, %v705_v35  ;;  %1019 = vst.msk [vmem:[%s1653_s16 + $0x18] sm:$0xff] %vm559_vm2, %v595_v36  ;;  %v706_v7 = vadd.f32 %v704_v61, %v518_v37  ;;  %v471_v30 = vadd.f32 %v1156_v45, %v1632_v58  ;;  %v1164_v41 = vpop.f32.mrb[4].mxu1  ;;  %v462_v42 = vpop.f32.mrb[5].mxu0  ;;  %v815_v55 = vadd.f32 %v813_v28, %v803_v11 }
 0x112   : > { %1043 = vst.msk [vmem:[%s1653_s16 + $0x58] sm:$0xff] %vm559_vm2, %v743_v20  ;;  %561 = vst.msk [vmem:[%s1653_s16 + $0x8] sm:$0xff] %vm559_vm2, %v558_v44  ;;  %v503_v24 = vadd.f32 %v1164_v41, %v1632_v58  ;;  %v463_v49 = vadd.f32 %v1632_v58, %v462_v42  ;;  %v494_v54 = vpop.f32.mrb[5].mxu1  ;;  %v1157_v51 = vpop.f32.mrb[6].mxu0 }
 0x113   : > { %1037 = vst.msk [vmem:[%s1653_s16 + $0x48] sm:$0xff] %vm559_vm2, %v706_v7  ;;  %v515_v59 = vmax.f32 %v471_v30, 0.0  ;;  %v495_v60 = vadd.f32 %v1632_v58, %v494_v54  ;;  %v474_v61 = vadd.f32 %v1157_v51, %v1632_v58  ;;  %v1165_v62 = vpop.f32.mrb[6].mxu1  ;;  %v465_v63 = vpop.f32.mrb[7].mxu0 }
 0x114   : > { %v523_v0 = vmax.f32 %v503_v24, 0.0  ;;  %v513_v52 = vmax.f32 %v463_v49, 0.0  ;;  %v506_v1 = vadd.f32 %v1165_v62, %v1632_v58  ;;  %v466_v38 = vadd.f32 %v1632_v58, %v465_v63  ;;  %v497_v53 = vpop.f32.mrb[7].mxu1 }
 0x115   : > { %v668_v3 = vadd.f32 %v666_v40, %v515_v59  ;;  %v521_v56 = vmax.f32 %v495_v60, 0.0  ;;  %v516_v4 = vmax.f32 %v474_v61, 0.0  ;;  %v498_v5 = vadd.f32 %v1632_v58, %v497_v53 }
 0x116   : > { %v816_v6 = vadd.f32 %v814_v48, %v523_v0  ;;  %v631_v8 = vadd.f32 %v1621_v50, %v513_v52  ;;  %v524_v43 = vmax.f32 %v506_v1, 0.0  ;;  %v514_v57 = vmax.f32 %v466_v38, 0.0 }
 0x117   : > { %1030 = vst.msk [vmem:[%s1653_s16 + $0x30] sm:$0xff] %vm559_vm2, %v668_v3  ;;  %v779_v9 = vadd.f32 %v777_v23, %v521_v56  ;;  %v669_v10 = vadd.f32 %v667_v46, %v516_v4  ;;  %v522_v11 = vmax.f32 %v498_v5, 0.0 }
 0x118   : > { %1054 = vst.msk [vmem:[%s1653_s16 + $0x70] sm:$0xff] %vm559_vm2, %v816_v6  ;;  %1024 = vst.msk [vmem:[%s1653_s16 + $0x20] sm:$0xff] %vm559_vm2, %v631_v8  ;;  %v817_v12 = vadd.f32 %v815_v55, %v524_v43  ;;  %v632_v13 = vadd.f32 %v630_v39, %v514_v57 }
 0x119   : > { %1048 = vst.msk [vmem:[%s1653_s16 + $0x60] sm:$0xff] %vm559_vm2, %v779_v9  ;;  %1031 = vst.msk [vmem:[%s1653_s16 + $0x38] sm:$0xff] %vm559_vm2, %v669_v10  ;;  %v780_v58 = vadd.f32 %v778_v47, %v522_v11 }
 0x11a   : > { %1055 = vst.msk [vmem:[%s1653_s16 + $0x78] sm:$0xff] %vm559_vm2, %v817_v12  ;;  %1025 = vst.msk [vmem:[%s1653_s16 + $0x28] sm:$0xff] %vm559_vm2, %v632_v13 }
 0x11b   : > { %1049 = vst.msk [vmem:[%s1653_s16 + $0x68] sm:$0xff] %vm559_vm2, %v780_v58 }
 0x11c PF: > { %s1744_s29 = sld [smem:[#allocation8_spill]]  ;;  %s1745_s1 = sld [smem:[#allocation6_spill]] }
 0x11d   : > { %s1746_s10 = sld [smem:[#allocation7_spill]]  ;;  %s1747_s11 = sld [smem:[#allocation9_spill]] }
 0x11e   : > { %s1748_s12 = sld [smem:[#allocation10_spill]] }
 0x122   : > { %s27_s13 = sadd.s32 1, %s1744_s29  }
 0x123   : > { %p24_p4 = scmp.ge.s32.totalorder %s27_s13, 6  }
 0x125   :  { %26 = sbr.rel (!%p24_p4) target bundleno = 30 (0x1e), region = 99 }

</bundles_post_ra>
